<compile_context>
chip_gen: v7x
topology: tpu7x:2x2x1
jax: 0.10.0
libtpu: 0.0.40
codegen_flags: <defaults>
</compile_context>

<pallas_src>
import functools

import jax
import jax.numpy as jnp
from jax import lax
from jax.experimental import pallas as pl
from jax.experimental.pallas import tpu as pltpu


# ----------------------------- kernels --------------------------------------

def _revin_norm_kernel(x_ref, w_ref, b_ref, y_ref, stats_ref, *, eps, affine, seq_len):
    # Single f32 view of the block; identity when x is already f32, and when x
    # is bf16 this is the same promotion the final FMA would need anyway.
    xf = x_ref[...].astype(jnp.float32)                                    # (Bt, T, C)
    inv_t = jnp.float32(1.0 / seq_len)

    # One-pass stats (single read of the block for both reductions).
    s1 = jnp.sum(xf, axis=1, keepdims=True)                                # (Bt, 1, C)
    s2 = jnp.sum(xf * xf, axis=1, keepdims=True)                           # (Bt, 1, C)
    mean = s1 * inv_t
    var = jnp.maximum(s2 * inv_t - mean * mean, 0.0)                       # biased var
    v = var + jnp.float32(eps)
    inv_std = lax.rsqrt(v)                                                 # per-channel only
    std = jnp.sqrt(v)

    if affine:
        scale = w_ref[...] * inv_std                                       # (Bt, 1, C)
        shift = b_ref[...] - mean * scale
    else:
        scale = inv_std
        shift = -mean * scale

    # One FMA per element (per-(batch,channel) scale/shift broadcast over T).
    y_ref[...] = (xf * scale + shift).astype(y_ref.dtype)
    stats_ref[:, 0:1, :] = mean.astype(stats_ref.dtype)
    stats_ref[:, 1:2, :] = std.astype(stats_ref.dtype)


def _revin_denorm_kernel(x_ref, w_ref, b_ref, stats_ref, y_ref, *, eps, affine):
    xf = x_ref[...].astype(jnp.float32)                                    # (Bt, T, C)
    mean = stats_ref[:, 0:1, :]                                            # (Bt, 1, C) f32
    std = stats_ref[:, 1:2, :]
    if affine:
        # Per-channel divide only (T-independent), then one FMA per element.
        scale = std / (w_ref[...] + jnp.float32(eps * eps))
        shift = mean - b_ref[...] * scale
    else:
        scale = std
        shift = mean
    y_ref[...] = (xf * scale + shift).astype(y_ref.dtype)


# ----------------------------- wrappers -------------------------------------

_VMEM_LIMIT_BYTES = 32 << 20   # safe on v5e/v6e (128 MiB phys) and v7x (64 MiB phys)
_VMEM_BUDGET_BYTES = 24 << 20  # headroom under the limit for the tile picker


def _pick_batch_tile(B, T, C, itemsize):
    """Largest divisor of B whose (Bt, T, C) slab keeps the double-buffered
    input + output plus in-kernel f32 temps inside the VMEM budget."""
    # per element: 2x in + 2x out (double-buffered, native dtype) + ~2 f32 temps
    per_row = max(1, T * C * (4 * itemsize + 8))
    cap = max(1, _VMEM_BUDGET_BYTES // per_row)
    bt = 1
    for d in range(1, min(B, cap) + 1):
        if B % d == 0:
            bt = d
    return bt


@functools.partial(jax.jit, static_argnames=("eps", "affine"))
def revin_norm(x, weight, bias, *, eps=1e-5, affine=True):
    """x: (B, T, C) -> (normalized x, stats (B, 2, C) = [mean; std])."""
    B, T, C = x.shape
    w3 = weight.reshape(1, 1, C).astype(jnp.float32)
    b3 = bias.reshape(1, 1, C).astype(jnp.float32)
    bt = _pick_batch_tile(B, T, C, jnp.dtype(x.dtype).itemsize)

    kernel = functools.partial(_revin_norm_kernel, eps=eps, affine=affine, seq_len=T)

    x_spec = pl.BlockSpec((bt, T, C), lambda i: (i, 0, 0))
    p_spec = pl.BlockSpec((1, 1, C), lambda i: (0, 0, 0))
    stats_spec = pl.BlockSpec((bt, 2, C), lambda i: (i, 0, 0))

    # TODO(synk): for very long T (whole-T slab > VMEM budget), tile the
    # reduction over a second ("arbitrary") grid axis with sum/sum-sq
    # accumulators in VMEM scratch instead of whole-T slabs.
    y, stats = pl.pallas_call(
        kernel,
        out_shape=(
            jax.ShapeDtypeStruct((B, T, C), x.dtype),
            jax.ShapeDtypeStruct((B, 2, C), jnp.float32),
        ),
        grid_spec=pltpu.PrefetchScalarGridSpec(
            num_scalar_prefetch=0,
            grid=(B // bt,),
            in_specs=[x_spec, p_spec, p_spec],
            out_specs=[x_spec, stats_spec],
        ),
        compiler_params=pltpu.CompilerParams(
            dimension_semantics=("parallel",),
            vmem_limit_bytes=_VMEM_LIMIT_BYTES,
        ),
    )(x, w3, b3)
    return y, stats


@functools.partial(jax.jit, static_argnames=("eps", "affine"))
def revin_denorm(x, weight, bias, stats, *, eps=1e-5, affine=True):
    """Inverse transform using stored statistics. x: (B, T, C), stats: (B, 2, C)."""
    B, T, C = x.shape
    w3 = weight.reshape(1, 1, C).astype(jnp.float32)
    b3 = bias.reshape(1, 1, C).astype(jnp.float32)
    bt = _pick_batch_tile(B, T, C, jnp.dtype(x.dtype).itemsize)

    kernel = functools.partial(_revin_denorm_kernel, eps=eps, affine=affine)

    x_spec = pl.BlockSpec((bt, T, C), lambda i: (i, 0, 0))
    p_spec = pl.BlockSpec((1, 1, C), lambda i: (0, 0, 0))
    stats_spec = pl.BlockSpec((bt, 2, C), lambda i: (i, 0, 0))

    y = pl.pallas_call(
        kernel,
        out_shape=jax.ShapeDtypeStruct((B, T, C), x.dtype),
        grid_spec=pltpu.PrefetchScalarGridSpec(
            num_scalar_prefetch=0,
            grid=(B // bt,),
            in_specs=[x_spec, p_spec, p_spec, stats_spec],
            out_specs=x_spec,
        ),
        compiler_params=pltpu.CompilerParams(
            dimension_semantics=("parallel",),
            vmem_limit_bytes=_VMEM_LIMIT_BYTES,
        ),
    )(x, w3, b3, stats)
    return y


class RevIN:
    """JAX/Pallas port of the PyTorch RevIN module (forward pass only)."""

    def __init__(self, num_features: int, eps=1e-5, affine=True):
        self.num_features = num_features
        self.eps = eps
        self.affine = affine
        # deterministic parameter init, matching nn.Parameter(ones / zeros)
        self.affine_weight = jnp.ones((num_features,), jnp.float32)
        self.affine_bias = jnp.zeros((num_features,), jnp.float32)
        self.stats = None      # (B, 2, C): [mean; std]
        self.mean = None
        self.stdev = None

    def __call__(self, x, mode: str):
        if mode == "norm":
            y, self.stats = revin_norm(
                x, self.affine_weight, self.affine_bias,
                eps=self.eps, affine=self.affine)
            self.mean = self.stats[:, 0:1, :]
            self.stdev = self.stats[:, 1:2, :]
            return y
        elif mode == "denorm":
            assert self.stats is not None
            return revin_denorm(
                x, self.affine_weight, self.affine_bias, self.stats,
                eps=self.eps, affine=self.affine)
        else:
            raise NotImplementedError


# ----------------------------- reference + main ------------------------------

def _ref_norm(x, w, b, eps):
    mean = jnp.mean(x, axis=1, keepdims=True)
    std = jnp.sqrt(jnp.var(x, axis=1, keepdims=True) + eps)
    return ((x - mean) / std) * w + b, mean, std


def _ref_denorm(x, w, b, mean, std, eps):
    return ((x - b) / (w + eps * eps)) * std + mean


if __name__ == "__main__":
    key = jax.random.PRNGKey(0)
    B, T, C = 2, 8, 4          # batch, seq_len, num_features
    x = jax.random.normal(key, (B, T, C), dtype=jnp.float32) * 3.0 + 1.5

    layer = RevIN(num_features=C, eps=1e-5, affine=True)
    # perturb affine params deterministically so the affine path is exercised
    layer.affine_weight = jnp.linspace(0.5, 1.5, C, dtype=jnp.float32)
    layer.affine_bias = jnp.linspace(-0.2, 0.2, C, dtype=jnp.float32)

    y_norm = layer(x, "norm")
    y_denorm = layer(y_norm, "denorm")
    jax.block_until_ready((y_norm, y_denorm))

    # correctness check against pure-JAX reference
    ref_y, ref_mean, ref_std = _ref_norm(x, layer.affine_weight, layer.affine_bias, layer.eps)
    ref_back = _ref_denorm(ref_y, layer.affine_weight, layer.affine_bias,
                           ref_mean, ref_std, layer.eps)
    assert jnp.allclose(y_norm, ref_y, atol=1e-5, rtol=1e-5)
    assert jnp.allclose(layer.mean, ref_mean, atol=1e-5, rtol=1e-5)
    assert jnp.allclose(layer.stdev, ref_std, atol=1e-5, rtol=1e-5)
    assert jnp.allclose(y_denorm, ref_back, atol=1e-5, rtol=1e-5)
    assert jnp.allclose(y_denorm, x, atol=1e-3, rtol=1e-3)  # round-trip ~ identity

    print("KERNEL_OK")
</pallas_src>

<mosaic_0001>
module attributes {stable_mosaic.version = 11 : i64} {
  func.func @_revin_norm_kernel(%arg0: i32, %arg1: memref<2x8x4xf32, #tpu.memory_space<vmem>>, %arg2: memref<1x1x4xf32, #tpu.memory_space<vmem>>, %arg3: memref<1x1x4xf32, #tpu.memory_space<vmem>>, %arg4: memref<2x8x4xf32, #tpu.memory_space<vmem>>, %arg5: memref<2x2x4xf32, #tpu.memory_space<vmem>>) attributes {dimension_semantics = [#tpu.dimension_semantics<parallel>], iteration_bounds = array<i64: 1>, scalar_prefetch = 0 : i64, scratch_operands = 0 : i64, tpu.core_type = #tpu.core_type<tc>, window_params = [{transform_indices = @transform_0, window_bounds = array<i64: 2, 8, 4>}, {pipeline_mode = #tpu.pipeline_mode<synchronous>, transform_indices = @transform_1, window_bounds = array<i64: 1, 1, 4>}, {pipeline_mode = #tpu.pipeline_mode<synchronous>, transform_indices = @transform_2, window_bounds = array<i64: 1, 1, 4>}, {transform_indices = @transform_3, window_bounds = array<i64: 2, 8, 4>}, {transform_indices = @transform_4, window_bounds = array<i64: 2, 2, 4>}]} {
    %c0 = arith.constant 0 : index
    %c0_0 = arith.constant 0 : index
    %c0_1 = arith.constant 0 : index
    %0 = vector.load %arg1[%c0, %c0_0, %c0_1] : memref<2x8x4xf32, #tpu.memory_space<vmem>>, vector<2x8x4xf32>
    %cst = arith.constant dense<0.000000e+00> : vector<2x4xf32>
    %1 = vector.multi_reduction <add>, %0, %cst [1] : vector<2x8x4xf32> to vector<2x4xf32>
    %2 = vector.shape_cast %1 : vector<2x4xf32> to vector<2x1x4xf32>
    %3 = arith.mulf %0, %0 : vector<2x8x4xf32>
    %cst_2 = arith.constant dense<0.000000e+00> : vector<2x4xf32>
    %4 = vector.multi_reduction <add>, %3, %cst_2 [1] : vector<2x8x4xf32> to vector<2x4xf32>
    %5 = vector.shape_cast %4 : vector<2x4xf32> to vector<2x1x4xf32>
    %cst_3 = arith.constant 1.250000e-01 : f32
    %6 = vector.broadcast %cst_3 : f32 to vector<2x1x4xf32>
    %7 = arith.mulf %2, %6 : vector<2x1x4xf32>
    %cst_4 = arith.constant 1.250000e-01 : f32
    %8 = vector.broadcast %cst_4 : f32 to vector<2x1x4xf32>
    %9 = arith.mulf %5, %8 : vector<2x1x4xf32>
    %10 = arith.mulf %7, %7 : vector<2x1x4xf32>
    %11 = arith.subf %9, %10 : vector<2x1x4xf32>
    %cst_5 = arith.constant 0.000000e+00 : f32
    %12 = vector.broadcast %cst_5 : f32 to vector<2x1x4xf32>
    %13 = arith.maximumf %11, %12 : vector<2x1x4xf32>
    %cst_6 = arith.constant 9.99999974E-6 : f32
    %14 = vector.broadcast %cst_6 : f32 to vector<2x1x4xf32>
    %15 = arith.addf %13, %14 : vector<2x1x4xf32>
    %16 = math.rsqrt %15 : vector<2x1x4xf32>
    %17 = math.sqrt %15 : vector<2x1x4xf32>
    %c0_7 = arith.constant 0 : index
    %c0_8 = arith.constant 0 : index
    %c0_9 = arith.constant 0 : index
    %18 = vector.load %arg2[%c0_7, %c0_8, %c0_9] : memref<1x1x4xf32, #tpu.memory_space<vmem>>, vector<1x1x4xf32>
    %19 = vector.broadcast %18 : vector<1x1x4xf32> to vector<2x1x4xf32>
    %20 = arith.mulf %19, %16 : vector<2x1x4xf32>
    %c0_10 = arith.constant 0 : index
    %c0_11 = arith.constant 0 : index
    %c0_12 = arith.constant 0 : index
    %21 = vector.load %arg3[%c0_10, %c0_11, %c0_12] : memref<1x1x4xf32, #tpu.memory_space<vmem>>, vector<1x1x4xf32>
    %22 = arith.mulf %7, %20 : vector<2x1x4xf32>
    %23 = vector.broadcast %21 : vector<1x1x4xf32> to vector<2x1x4xf32>
    %24 = arith.subf %23, %22 : vector<2x1x4xf32>
    %25 = vector.broadcast %20 : vector<2x1x4xf32> to vector<2x8x4xf32>
    %26 = arith.mulf %0, %25 : vector<2x8x4xf32>
    %27 = vector.broadcast %24 : vector<2x1x4xf32> to vector<2x8x4xf32>
    %28 = arith.addf %26, %27 : vector<2x8x4xf32>
    %c0_13 = arith.constant 0 : index
    %c0_14 = arith.constant 0 : index
    %c0_15 = arith.constant 0 : index
    %29 = vector.load %arg4[%c0_13, %c0_14, %c0_15] : memref<2x8x4xf32, #tpu.memory_space<vmem>>, vector<2x8x4xf32>
    tpu.vector_store %arg4[%c0_13, %c0_14, %c0_15], %28 {strides = array<i32>} : memref<2x8x4xf32, #tpu.memory_space<vmem>>, vector<2x8x4xf32>,
    %c0_16 = arith.constant 0 : index
    %c0_17 = arith.constant 0 : index
    %c0_18 = arith.constant 0 : index
    %30 = vector.load %arg5[%c0_16, %c0_17, %c0_18] : memref<2x2x4xf32, #tpu.memory_space<vmem>>, vector<2x1x4xf32>
    tpu.vector_store %arg5[%c0_16, %c0_17, %c0_18], %7 {strides = array<i32>} : memref<2x2x4xf32, #tpu.memory_space<vmem>>, vector<2x1x4xf32>,
    %c0_19 = arith.constant 0 : index
    %c1 = arith.constant 1 : index
    %c0_20 = arith.constant 0 : index
    %31 = vector.load %arg5[%c0_19, %c1, %c0_20] : memref<2x2x4xf32, #tpu.memory_space<vmem>>, vector<2x1x4xf32>
    tpu.vector_store %arg5[%c0_19, %c1, %c0_20], %17 {strides = array<i32>} : memref<2x2x4xf32, #tpu.memory_space<vmem>>, vector<2x1x4xf32>,
    return
  }
  func.func @transform_0(%arg0: i32) -> (i32, i32, i32) {
    %c0_i32 = arith.constant 0 : i32
    %c0_i32_0 = arith.constant 0 : i32
    %c0_i32_1 = arith.constant 0 : i32
    return %arg0, %c0_i32, %c0_i32_0 : i32, i32, i32
  }
  func.func @transform_1(%arg0: i32) -> (i32, i32, i32) {
    %c0_i32 = arith.constant 0 : i32
    %c0_i32_0 = arith.constant 0 : i32
    %c0_i32_1 = arith.constant 0 : i32
    %c0_i32_2 = arith.constant 0 : i32
    return %c0_i32, %c0_i32_0, %c0_i32_1 : i32, i32, i32
  }
  func.func @transform_2(%arg0: i32) -> (i32, i32, i32) {
    %c0_i32 = arith.constant 0 : i32
    %c0_i32_0 = arith.constant 0 : i32
    %c0_i32_1 = arith.constant 0 : i32
    %c0_i32_2 = arith.constant 0 : i32
    return %c0_i32, %c0_i32_0, %c0_i32_1 : i32, i32, i32
  }
  func.func @transform_3(%arg0: i32) -> (i32, i32, i32) {
    %c0_i32 = arith.constant 0 : i32
    %c0_i32_0 = arith.constant 0 : i32
    %c0_i32_1 = arith.constant 0 : i32
    return %arg0, %c0_i32, %c0_i32_0 : i32, i32, i32
  }
  func.func @transform_4(%arg0: i32) -> (i32, i32, i32) {
    %c0_i32 = arith.constant 0 : i32
    %c0_i32_0 = arith.constant 0 : i32
    %c0_i32_1 = arith.constant 0 : i32
    return %arg0, %c0_i32, %c0_i32_0 : i32, i32, i32
  }
}

</mosaic_0001>

<bundles_post_ra>
// kernel: revin_norm.1
= control target key start
LH: loop header
LB: loop body
LE: loop exit
PB: predicated region body
PF: predicated region fallthrough
CT: control target
= control target key end

     0   :  { %vm19_vm0 = vcmask 31744   ;;  %s253_s0 = inlined_call_operand.vmem [shape: f32[2,8,4], index: 0, kind: input, shape index: {}]   ;;  %s254_s1 = inlined_call_operand.vmem [shape: f32[1,1,4], index: 1, kind: input, shape index: {}]   ;;  %s255_s2 = inlined_call_operand.vmem [shape: f32[1,1,4], index: 2, kind: input, shape index: {}]   ;;  %s256_s3 = inlined_call_operand.vmem [shape: f32[2,8,4], index: 3, kind: output, shape index: {0}]   ;;  %s257_s4 = inlined_call_operand.hbm [shape: f32[2,2,4], index: 4, kind: output, shape index: {1}]  }
   0x1   :  { %v203_v0 = vld [vmem:[%s253_s0] sm:$0xff]  ;;  %v208_v1 = vld [vmem:[%s253_s0 + $0x8] sm:$0xff] }
   0x2   :  { %v20_v2 = vsel %vm19_vm0, %v203_v0, 0.0  ;;  %v34_v3 = vmul.f32 %v203_v0, %v203_v0  ;;  %v27_v4 = vsel %vm19_vm0, %v208_v1, 0.0  ;;  %v35_v5 = vmul.f32 %v208_v1, %v208_v1 }
   0x3   :  { %10 = vsyncpa [#allocation3], 0  ;;  %v21_v6 = vrot.slane %v20_v2, 4  ;;  %v28_v7 = vrot.slane %v27_v4, 4  ;;  %vm116_vm1 = vcmask 24576   ;;  %v88_v44 = vlaneseq  ;;  %s172_s20 = smov [#allocation2]  }
   0x4   :  { %v36_v8 = vsel %vm19_vm0, %v34_v3, 0.0  ;;  %v43_v9 = vsel %vm19_vm0, %v35_v5, 0.0  ;;  %v78_v46 = vld [vmem:[%s254_s1] sm:$0x1]  ;;  %s128_s21 = sshll.u32 %s172_s20, 4  ;;  %s129_s21 = int_to_ptr.vmem [resolvable:$true] %s128_s21 }
   0x5   :  { %v22_v10 = vadd.f32 %v21_v6, %v20_v2  ;;  %v37_v11 = vrot.slane %v36_v8, 4  ;;  %v29_v12 = vadd.f32 %v28_v7, %v27_v4  ;;  %v44_v13 = vrot.slane %v43_v9, 4  ;;  %v81_v55 = vld [vmem:[%s255_s2] sm:$0x1]  ;;  %s148_s1 = scalar_lea.vmem %s129_s21, 64  ;;  %p153_p1 = scmp.lt.s32.totalorder %s129_s21, %s129_s21 }
   0x6   :  { %v89_v45 = vshrl.u32 %v88_v44, 7  ;;  %p149_p0 = scmp.ne.s32.totalorder %s129_s21, %s148_s1  ;;  %p154_p2 = scmp.lt.s32.totalorder %s148_s1, %s148_s1 }
   0x7   :  { %v23_v14 = vrot.slane %v22_v10, 2  ;;  %v38_v15 = vadd.f32 %v37_v11, %v36_v8  ;;  %v30_v16 = vrot.slane %v29_v12, 2  ;;  %v45_v17 = vadd.f32 %v44_v13, %v43_v9 }
   0x8   :  { %v90_v47 = vsub.s32 0, %v89_v45  ;;  %p155_p3 = por %p154_p2, %p153_p1 }
   0x9   :  { %v24_v18 = vadd.f32 %v23_v14, %v22_v10  ;;  %v39_v19 = vrot.slane %v38_v15, 2  ;;  %v31_v20 = vadd.f32 %v30_v16, %v29_v12  ;;  %v46_v21 = vrot.slane %v45_v17, 2 }
   0xa   :  { %p156_p4 = pnand %p155_p3, %p149_p0 }
   0xb   :  { %v25_v22 = vrot.slane %v24_v18, 1  ;;  %v40_v23 = vadd.f32 %v39_v19, %v38_v15  ;;  %v32_v24 = vrot.slane %v31_v20, 1  ;;  %v47_v25 = vadd.f32 %v46_v21, %v45_v17 }
   0xd   :  { %v26_v26 = vadd.f32 %v25_v22, %v24_v18  ;;  %v41_v27 = vrot.slane %v40_v23, 1  ;;  %v33_v28 = vadd.f32 %v32_v24, %v31_v20  ;;  %v48_v29 = vrot.slane %v47_v25, 1 }
   0xf   :  { %v42_v30 = vadd.f32 %v41_v27, %v40_v23  ;;  %v50_v31 = vmul.f32 0.125, %v26_v26  ;;  %v49_v32 = vadd.f32 %v48_v29, %v47_v25  ;;  %v51_v33 = vmul.f32 0.125, %v33_v28 }
  0x11   :  { %v52_v34 = vmul.f32 0.125, %v42_v30  ;;  %v54_v35 = vmul.f32 %v50_v31, %v50_v31  ;;  %117 = vst.msk [vmem:[#allocation2] sm:$0x1] %vm116_vm1, %v50_v31  ;;  %v53_v36 = vmul.f32 0.125, %v49_v32  ;;  %v55_v37 = vmul.f32 %v51_v33, %v51_v33  ;;  %118 = vst.msk [vmem:[#allocation2 + $0x2] sm:$0x1] %vm116_vm1, %v51_v33 }
  0x13   :  { %v56_v38 = vsub.f32 %v52_v34, %v54_v35  ;;  %v57_v39 = vsub.f32 %v53_v36, %v55_v37 }
  0x15   :  { %v58_v40 = vmax.f32 %v56_v38, 0.0  ;;  %v59_v41 = vmax.f32 %v57_v39, 0.0 }
  0x17   :  { %v60_v42 = vadd.f32 1e-05, %v58_v40  ;;  %v61_v43 = vadd.f32 1e-05, %v59_v41 }
  0x19   :  { %144 = vrsqrt.f32 %v60_v42  ;;  %vm66_vm2 = vcmp.eq.f32.partialorder %v60_v42, inf  ;;  %vm68_vm3 = vcmp.eq.f32.partialorder %v60_v42, 0.0  ;;  %v69_v49 = vand.u32 2147483648, %v60_v42 }
  0x1a   :  { %146 = vrsqrt.f32 %v61_v43  ;;  %vm73_vm4 = vcmp.eq.f32.partialorder %v61_v43, inf  ;;  %v76_v52 = vand.u32 2147483648, %v61_v43  ;;  %vm75_vm5 = vcmp.eq.f32.partialorder %v61_v43, 0.0 }
  0x23   :  { %v145_v48 = vpop.eup %144 }
  0x24   :  { %v147_v50 = vpop.eup %146  ;;  %v65_v51 = vmul.f32 %v145_v48, %v60_v42  ;;  %v79_v53 = vmul.f32 %v145_v48, %v78_v46 }
  0x25   :  { %v72_v54 = vmul.f32 %v147_v50, %v61_v43  ;;  %v80_v56 = vmul.f32 %v147_v50, %v78_v46 }
  0x26   :  { %v67_v57 = vsel %vm66_vm2, %v60_v42, %v65_v51  ;;  %v82_v58 = vmul.f32 %v79_v53, %v50_v31  ;;  %v91_v59 = vrot.slane %v79_v53, %v90_v47 }
  0x27   :  { %v70_v60 = vsel %vm68_vm3, %v69_v49, %v67_v57  ;;  %v74_v61 = vsel %vm73_vm4, %v61_v43, %v72_v54  ;;  %v83_v62 = vmul.f32 %v80_v56, %v51_v33  ;;  %v95_v63 = vrot.slane %v80_v56, %v90_v47 }
  0x28   :  { %119 = vst.msk [vmem:[#allocation2 + $0x1] sm:$0x1] %vm116_vm1, %v70_v60  ;;  %v77_v2 = vsel %vm75_vm5, %v76_v52, %v74_v61  ;;  %v84_v3 = vsub.f32 %v81_v55, %v82_v58  ;;  %v98_v4 = vmul.f32 %v91_v59, %v203_v0 }
  0x29   :  { %120 = vst.msk [vmem:[#allocation2 + $0x3] sm:$0x1] %vm116_vm1, %v77_v2  ;;  %v85_v5 = vsub.f32 %v81_v55, %v83_v62  ;;  %v99_v6 = vmul.f32 %v95_v63, %v208_v1 }
  0x2a   :  { %v105_v7 = vrot.slane %v84_v3, %v90_v47 }
  0x2b   :  { %159 = shalt.err (!%p156_p4)
}
  0x2c   :  { %s160_s25 = scalar_lea.hbm %s257_s4, 64 }
  0x2d   :  { %p161_p5 = scmp.ne.s32.totalorder %s257_s4, %s160_s25  ;;  %p164_p6 = scmp.lt.u32.totalorder %s160_s25, %s257_s4 }
  0x2f   :  { %p166_p7 = pnand %p164_p6, %p161_p5 }
  0x31   :  { %169 = shalt.err (!%p166_p7)
}
  0x32   :  { %s173_s30 = smov 32   ;;  %s174_s5 = smov 2   ;;  %v109_v0 = vrot.slane %v85_v5, %v90_v47  ;;  %v112_v1 = vadd.f32 %v105_v7, %v98_v4 }
  0x33   :  { %134 = dma.vmem_to_hbm [thread:$0]  %s129_s21, 64, %s257_s4, [#allocation3], %s173_s30, %s173_s30, %s174_s5  }
  0x34   :  { %v113_v8 = vadd.f32 %v109_v0, %v99_v6  ;;  %114 = vst.msk [vmem:[%s256_s3] sm:$0xff] %vm19_vm0, %v112_v1 }
  0x36   :  { %115 = vst.msk [vmem:[%s256_s3 + $0x8] sm:$0xff] %vm19_vm0, %v113_v8 }
  0x37   :  { %170 = dma.done.wait [#allocation3], 64  }
  0x38   :  { %171 = vsyncadd [#allocation3], 4294967232 }
  0x39   :  { %140 = vsyncpa [#allocation3], 1 }

</bundles_post_ra>
